<compile_context>
chip_gen: v7x
topology: tpu7x:2x2x1
jax: 0.10.0
libtpu: 0.0.40
codegen_flags: <defaults>
</compile_context>

<pallas_src>
import functools

import jax
import jax.numpy as jnp
from jax.experimental import pallas as pl
from jax.experimental.pallas import tpu as pltpu

_MIB = 1024 * 1024


def _round_up(x, m):
    return ((x + m - 1) // m) * m


def _cdiv(a, b):
    return -(-a // b)


def _sublane_multiple(dtype):
    return {4: 8, 2: 16, 1: 32}.get(jnp.dtype(dtype).itemsize, 8)


def _vmem_capacity_bytes():
    try:
        info = pltpu.get_tpu_info()
        for name in ("vmem_capacity_bytes", "vmem_size_bytes", "vmem_bytes"):
            v = getattr(info, name, None)
            if v:
                return int(v)
    except Exception:
        pass
    return 64 * _MIB  # conservative fallback: fits every generation (v7x: 64 MiB/TC)


def _vmem_limit_bytes():
    cap = _vmem_capacity_bytes()
    # ~56 MiB on v7x (64 MiB/TC, headroom for Mosaic scratch); <=100 MiB on v5e/v6e.
    return min(cap * 7 // 8, 100 * _MIB)


# ----------------- resident-operand specs (single-buffer w/ fallback) ---------

_SINGLE_BUFFER_RESIDENT_OK = True  # flipped off if this Pallas rejects pl.Buffered(1)


def _resident_spec(shape, single_buffer):
    if single_buffer:
        return pl.BlockSpec(shape, lambda i: (0, 0), pipeline_mode=pl.Buffered(1))
    return pl.BlockSpec(shape, lambda i: (0, 0))


def _run_with_resident_fallback(build_and_run):
    global _SINGLE_BUFFER_RESIDENT_OK
    if _SINGLE_BUFFER_RESIDENT_OK:
        try:
            return build_and_run(True)
        except Exception:
            _SINGLE_BUFFER_RESIDENT_OK = False
    return build_and_run(False)


# ------------------------------- tile sizing ----------------------------------

def _pick_row_tile(rows, d_in, d_out, x_dtype, out_dtype, mxu_itemsize,
                   resident_bytes, row_tile, vmem_limit):
    sub = max(_sublane_multiple(x_dtype), _sublane_multiple(out_dtype))
    xb = jnp.dtype(x_dtype).itemsize
    ob = jnp.dtype(out_dtype).itemsize
    budget = max(vmem_limit - resident_bytes, 0)

    def tile_bytes(rt):
        io = 2 * rt * d_in * xb + 2 * rt * d_out * ob              # double-buffered x / out
        tmp = 3 * rt * d_in * 4 + rt * d_in * mxu_itemsize + rt * d_out * 4  # f32 LN temps + MXU operand + acc
        return io + tmp

    rt_cap = _round_up(rows, sub)
    rt = _round_up(max(sub, min(row_tile, rt_cap)), sub)

    # Prefer not to drop below ~256 rows: memory-bound roofline needs big tiles.
    floor_big = min(rt, _round_up(256, sub))
    while rt > floor_big and tile_bytes(rt) > budget:
        rt = _round_up(max(floor_big, rt // 2), sub)
    # TODO(synk): if even floor_big doesn't fit (huge d_in*d_out on v7x), add a
    # K-reduction grid axis + f32 accumulator scratch instead of shrinking rt.
    while rt > sub and tile_bytes(rt) > budget:
        rt = _round_up(max(sub, rt // 2), sub)

    # Keep >=2 grid steps when rows allow, so v7x's two TensorCores both get work.
    if rt_cap >= 2 * sub:
        rt = min(rt, _round_up(_cdiv(rows, 2), sub))
    return rt


# --------------------- fused LayerNorm + Linear kernels ------------------------

def _fused_ln_linear_kernel(x_ref, g_ref, b_ref, w_ref, bias_ref, o_ref, *, eps):
    x = x_ref[...].astype(jnp.float32)                        # (rt, d_in)
    mean = jnp.mean(x, axis=-1, keepdims=True)
    xc = x - mean
    var = jnp.mean(xc * xc, axis=-1, keepdims=True)           # biased (torch LN)
    y = xc * jax.lax.rsqrt(var + eps) * g_ref[...] + b_ref[...]
    y = y.astype(w_ref.dtype)                                 # MXU operands in W dtype
    acc = jnp.dot(y, w_ref[...], preferred_element_type=jnp.float32)
    o_ref[...] = (acc + bias_ref[...]).astype(o_ref.dtype)


def _fused_ln_linear_folded_kernel(x_ref, w_ref, bias_ref, o_ref, *, eps):
    # gamma/beta pre-folded into (w, bias) offline -> fewer VPU ops per tile.
    x = x_ref[...].astype(jnp.float32)
    mean = jnp.mean(x, axis=-1, keepdims=True)
    xc = x - mean
    var = jnp.mean(xc * xc, axis=-1, keepdims=True)
    y = (xc * jax.lax.rsqrt(var + eps)).astype(w_ref.dtype)
    acc = jnp.dot(y, w_ref[...], preferred_element_type=jnp.float32)
    o_ref[...] = (acc + bias_ref[...]).astype(o_ref.dtype)


def prenorm_linear_pallas(x2d, gamma, beta, w, bias, *, eps=1e-5,
                          row_tile=1024, mxu_dtype=None):
    """Fused LayerNorm(last axis) -> Linear on a 2-D (rows, d_in) array.

    gamma/beta may be None if already folded into (w, bias) via fold_ln_into_linear().
    """
    rows, d_in = x2d.shape
    d_out = w.shape[1]
    out_dtype = x2d.dtype
    vmem_limit = _vmem_limit_bytes()

    w_c = w if (mxu_dtype is None or w.dtype == mxu_dtype) else w.astype(mxu_dtype)
    w_bytes = w_c.size * jnp.dtype(w_c.dtype).itemsize
    bias2 = bias.reshape(1, d_out).astype(jnp.float32)
    folded = gamma is None
    if not folded:
        gamma2 = gamma.reshape(1, d_in).astype(jnp.float32)
        beta2 = beta.reshape(1, d_in).astype(jnp.float32)

    xb = jnp.dtype(x2d.dtype).itemsize
    ob = jnp.dtype(out_dtype).itemsize

    def build_and_run(single_buffer):
        n_buf = 1 if single_buffer else 2
        resident = n_buf * (w_bytes + 4 * d_out + (0 if folded else 8 * d_in))
        rt = _pick_row_tile(rows, d_in, d_out, x2d.dtype, out_dtype,
                            jnp.dtype(w_c.dtype).itemsize, resident,
                            row_tile, vmem_limit)
        grid = (_cdiv(rows, rt),)   # ragged last tile handled by Pallas; no pad/slice

        x_spec = pl.BlockSpec((rt, d_in), lambda i: (i, 0))
        o_spec = pl.BlockSpec((rt, d_out), lambda i: (i, 0))
        w_spec = _resident_spec((d_in, d_out), single_buffer)
        bias_spec = _resident_spec((1, d_out), single_buffer)

        if folded:
            kernel = functools.partial(_fused_ln_linear_folded_kernel, eps=eps)
            in_specs = [x_spec, w_spec, bias_spec]
            operands = (x2d, w_c, bias2)
        else:
            kernel = functools.partial(_fused_ln_linear_kernel, eps=eps)
            in_specs = [x_spec,
                        _resident_spec((1, d_in), single_buffer),
                        _resident_spec((1, d_in), single_buffer),
                        w_spec, bias_spec]
            operands = (x2d, gamma2, beta2, w_c, bias2)

        cost = pl.CostEstimate(
            flops=2 * rows * d_in * d_out + 8 * rows * d_in,
            transcendentals=rows,
            bytes_accessed=(rows * d_in * xb + rows * d_out * ob + w_bytes
                            + (0 if folded else 8 * d_in) + 4 * d_out),
        )

        return pl.pallas_call(
            kernel,
            out_shape=jax.ShapeDtypeStruct((rows, d_out), out_dtype),
            grid_spec=pltpu.PrefetchScalarGridSpec(
                num_scalar_prefetch=0,
                grid=grid,
                in_specs=in_specs,
                out_specs=o_spec,
            ),
            compiler_params=pltpu.CompilerParams(
                dimension_semantics=("parallel",),
                vmem_limit_bytes=vmem_limit,
            ),
            cost_estimate=cost,
        )(*operands)

    return _run_with_resident_fallback(build_and_run)


# ------------------- standalone LayerNorm (for arbitrary fn) ------------------

def _layernorm_kernel(x_ref, g_ref, b_ref, o_ref, *, eps):
    x = x_ref[...].astype(jnp.float32)
    mean = jnp.mean(x, axis=-1, keepdims=True)
    xc = x - mean
    var = jnp.mean(xc * xc, axis=-1, keepdims=True)
    o_ref[...] = (xc * jax.lax.rsqrt(var + eps) * g_ref[...]
                  + b_ref[...]).astype(o_ref.dtype)


def layernorm_pallas(x2d, gamma, beta, *, eps=1e-5, row_tile=1024):
    rows, d = x2d.shape
    vmem_limit = _vmem_limit_bytes()
    gamma2 = gamma.reshape(1, d).astype(jnp.float32)
    beta2 = beta.reshape(1, d).astype(jnp.float32)

    def build_and_run(single_buffer):
        n_buf = 1 if single_buffer else 2
        rt = _pick_row_tile(rows, d, d, x2d.dtype, x2d.dtype, 4,
                            n_buf * 8 * d, row_tile, vmem_limit)
        grid = (_cdiv(rows, rt),)
        return pl.pallas_call(
            functools.partial(_layernorm_kernel, eps=eps),
            out_shape=jax.ShapeDtypeStruct((rows, d), x2d.dtype),
            grid_spec=pltpu.PrefetchScalarGridSpec(
                num_scalar_prefetch=0,
                grid=grid,
                in_specs=[
                    pl.BlockSpec((rt, d), lambda i: (i, 0)),
                    _resident_spec((1, d), single_buffer),
                    _resident_spec((1, d), single_buffer),
                ],
                out_specs=pl.BlockSpec((rt, d), lambda i: (i, 0)),
            ),
            compiler_params=pltpu.CompilerParams(
                dimension_semantics=("parallel",),
                vmem_limit_bytes=vmem_limit,
            ),
        )(x2d, gamma2, beta2)

    return _run_with_resident_fallback(build_and_run)


# --------------------------------- PreNorm -------------------------------------

def fold_ln_into_linear(gamma, beta, w, bias):
    """One-time (offline) fold of LN affine params into the Linear layer."""
    w32 = w.astype(jnp.float32)
    w_f = (gamma.astype(jnp.float32)[:, None] * w32).astype(w.dtype)
    b_f = beta.astype(jnp.float32) @ w32 + bias.astype(jnp.float32)
    return w_f, b_f


def pre_norm(x, gamma, beta, fn, *, eps=1e-5, **kwargs):
    """Generic PreNorm.forward: fn(LayerNorm(x), **kwargs) for arbitrary fn."""
    d = x.shape[-1]
    normed = layernorm_pallas(x.reshape(-1, d), gamma, beta, eps=eps)
    return fn(normed.reshape(x.shape), **kwargs)


def pre_norm_linear(x, gamma, beta, w, bias, *, eps=1e-5, mxu_dtype=None):
    """PreNorm with fn = Linear, fully fused in one Pallas kernel."""
    d = x.shape[-1]
    out = prenorm_linear_pallas(x.reshape(-1, d), gamma, beta, w, bias,
                                eps=eps, mxu_dtype=mxu_dtype)
    return out.reshape(x.shape[:-1] + (w.shape[1],))


def pre_norm_linear_folded(x, w_folded, bias_folded, *, eps=1e-5, mxu_dtype=None):
    """PreNorm+Linear with gamma/beta pre-folded (call fold_ln_into_linear once)."""
    d = x.shape[-1]
    out = prenorm_linear_pallas(x.reshape(-1, d), None, None, w_folded,
                                bias_folded, eps=eps, mxu_dtype=mxu_dtype)
    return out.reshape(x.shape[:-1] + (w_folded.shape[1],))


# ----------------------------------- main ---------------------------------------

if __name__ == "__main__":
    # Shapes implied by the module: LayerNorm(dim * 2) => last dim of x is dim*2.
    batch, seq, dim = 2, 8, 64
    d2 = dim * 2  # 128

    key = jax.random.PRNGKey(0)
    kx, kw, kb, kg, kbe = jax.random.split(key, 5)

    x = jax.random.normal(kx, (batch, seq, d2), dtype=jnp.float32)

    # Non-trivial LN affine params so all paths are exercised.
    gamma = 1.0 + 0.1 * jax.random.normal(kg, (d2,), dtype=jnp.float32)
    beta = 0.1 * jax.random.normal(kbe, (d2,), dtype=jnp.float32)

    # Demo `fn`: Linear(d2 -> d2), deterministic init.
    w = jax.random.normal(kw, (d2, d2), dtype=jnp.float32) / jnp.sqrt(d2)
    b = jax.random.normal(kb, (d2,), dtype=jnp.float32) * 0.01

    eps = 1e-5

    # Pure-JAX reference.
    mean = jnp.mean(x, axis=-1, keepdims=True)
    var = jnp.mean((x - mean) ** 2, axis=-1, keepdims=True)
    ref_norm = (x - mean) * jax.lax.rsqrt(var + eps) * gamma + beta
    ref = (ref_norm.reshape(-1, d2) @ w + b).reshape(x.shape)

    # 1) Fused LayerNorm + Linear (hot path, full-precision MXU).
    out_fused = jax.block_until_ready(pre_norm_linear(x, gamma, beta, w, b, eps=eps))
    assert jnp.allclose(out_fused, ref, atol=1e-4, rtol=1e-4), "fused mismatch"

    # 2) Fused path with bf16 MXU operands, f32 accumulation (v6e/v7x fast path).
    out_bf16 = jax.block_until_ready(
        pre_norm_linear(x, gamma, beta, w, b, eps=eps, mxu_dtype=jnp.bfloat16))
    assert jnp.allclose(out_bf16, ref, atol=5e-2, rtol=5e-2), "bf16 mismatch"

    # 3) Folded path: gamma/beta folded into (w, b) once offline.
    w_f, b_f = fold_ln_into_linear(gamma, beta, w, b)
    out_fold = jax.block_until_ready(pre_norm_linear_folded(x, w_f, b_f, eps=eps))
    assert jnp.allclose(out_fold, ref, atol=1e-3, rtol=1e-3), "folded mismatch"

    # 4) Generic path (arbitrary fn): LayerNorm kernel + plain-JAX fn.
    def fn(y):
        return (y.reshape(-1, d2) @ w + b).reshape(y.shape)

    out_generic = jax.block_until_ready(pre_norm(x, gamma, beta, fn, eps=eps))
    assert jnp.allclose(out_generic, ref, atol=1e-4, rtol=1e-4), "generic mismatch"

    print("KERNEL_OK")
</pallas_src>

<mosaic_0001>
module attributes {stable_mosaic.version = 11 : i64} {
  func.func @_fused_ln_linear_kernel(%arg0: i32, %arg1: memref<8x128xf32, #tpu.memory_space<vmem>>, %arg2: memref<1x128xf32, #tpu.memory_space<vmem>>, %arg3: memref<1x128xf32, #tpu.memory_space<vmem>>, %arg4: memref<128x128xf32, #tpu.memory_space<vmem>>, %arg5: memref<1x128xf32, #tpu.memory_space<vmem>>, %arg6: memref<8x128xf32, #tpu.memory_space<vmem>>) attributes {dimension_semantics = [#tpu.dimension_semantics<parallel>], iteration_bounds = array<i64: 2>, scalar_prefetch = 0 : i64, scratch_operands = 0 : i64, tpu.core_type = #tpu.core_type<tc>, window_params = [{transform_indices = @transform_0, window_bounds = array<i64: 8, 128>}, {pipeline_mode = #tpu.pipeline_mode<synchronous>, transform_indices = @transform_1, window_bounds = array<i64: 1, 128>}, {pipeline_mode = #tpu.pipeline_mode<synchronous>, transform_indices = @transform_2, window_bounds = array<i64: 1, 128>}, {pipeline_mode = #tpu.pipeline_mode<synchronous>, transform_indices = @transform_3, window_bounds = array<i64: 128, 128>}, {pipeline_mode = #tpu.pipeline_mode<synchronous>, transform_indices = @transform_4, window_bounds = array<i64: 1, 128>}, {transform_indices = @transform_5, window_bounds = array<i64: 8, 128>}]} {
    %c0 = arith.constant 0 : index
    %c0_0 = arith.constant 0 : index
    %0 = vector.load %arg1[%c0, %c0_0] : memref<8x128xf32, #tpu.memory_space<vmem>>, vector<8x128xf32>
    %cst = arith.constant dense<0.000000e+00> : vector<8xf32>
    %1 = vector.multi_reduction <add>, %0, %cst [1] : vector<8x128xf32> to vector<8xf32>
    %2 = vector.shape_cast %1 : vector<8xf32> to vector<8x1xf32>
    %cst_1 = arith.constant 1.280000e+02 : f32
    %3 = vector.broadcast %cst_1 : f32 to vector<8x1xf32>
    %4 = arith.divf %2, %3 : vector<8x1xf32>
    %5 = vector.broadcast %4 : vector<8x1xf32> to vector<8x128xf32>
    %6 = arith.subf %0, %5 : vector<8x128xf32>
    %7 = arith.mulf %6, %6 : vector<8x128xf32>
    %cst_2 = arith.constant dense<0.000000e+00> : vector<8xf32>
    %8 = vector.multi_reduction <add>, %7, %cst_2 [1] : vector<8x128xf32> to vector<8xf32>
    %9 = vector.shape_cast %8 : vector<8xf32> to vector<8x1xf32>
    %cst_3 = arith.constant 1.280000e+02 : f32
    %10 = vector.broadcast %cst_3 : f32 to vector<8x1xf32>
    %11 = arith.divf %9, %10 : vector<8x1xf32>
    %cst_4 = arith.constant 9.99999974E-6 : f32
    %12 = vector.broadcast %cst_4 : f32 to vector<8x1xf32>
    %13 = arith.addf %11, %12 : vector<8x1xf32>
    %14 = math.rsqrt %13 : vector<8x1xf32>
    %15 = vector.broadcast %14 : vector<8x1xf32> to vector<8x128xf32>
    %16 = arith.mulf %6, %15 : vector<8x128xf32>
    %c0_5 = arith.constant 0 : index
    %c0_6 = arith.constant 0 : index
    %17 = vector.load %arg2[%c0_5, %c0_6] : memref<1x128xf32, #tpu.memory_space<vmem>>, vector<1x128xf32>
    %18 = vector.broadcast %17 : vector<1x128xf32> to vector<8x128xf32>
    %19 = arith.mulf %16, %18 : vector<8x128xf32>
    %c0_7 = arith.constant 0 : index
    %c0_8 = arith.constant 0 : index
    %20 = vector.load %arg3[%c0_7, %c0_8] : memref<1x128xf32, #tpu.memory_space<vmem>>, vector<1x128xf32>
    %21 = vector.broadcast %20 : vector<1x128xf32> to vector<8x128xf32>
    %22 = arith.addf %19, %21 : vector<8x128xf32>
    %c0_9 = arith.constant 0 : index
    %c0_10 = arith.constant 0 : index
    %23 = vector.load %arg4[%c0_9, %c0_10] : memref<128x128xf32, #tpu.memory_space<vmem>>, vector<128x128xf32>
    %cst_11 = arith.constant dense<0.000000e+00> : vector<8x128xf32>
    %24 = tpu.matmul %22, %23, %cst_11 {dimension_numbers = #tpu.dot_dimension_numbers<[1], [0], [0], [1], [0, 0, 1, 1], [], []>} : vector<8x128xf32>, vector<128x128xf32>, vector<8x128xf32> -> vector<8x128xf32>
    %c0_12 = arith.constant 0 : index
    %c0_13 = arith.constant 0 : index
    %25 = vector.load %arg5[%c0_12, %c0_13] : memref<1x128xf32, #tpu.memory_space<vmem>>, vector<1x128xf32>
    %26 = vector.broadcast %25 : vector<1x128xf32> to vector<8x128xf32>
    %27 = arith.addf %24, %26 : vector<8x128xf32>
    %c0_14 = arith.constant 0 : index
    %c0_15 = arith.constant 0 : index
    %28 = vector.load %arg6[%c0_14, %c0_15] : memref<8x128xf32, #tpu.memory_space<vmem>>, vector<8x128xf32>
    tpu.vector_store %arg6[%c0_14, %c0_15], %27 {strides = array<i32>} : memref<8x128xf32, #tpu.memory_space<vmem>>, vector<8x128xf32>,
    return
  }
  func.func @transform_0(%arg0: i32) -> (i32, i32) {
    %c0_i32 = arith.constant 0 : i32
    %c0_i32_0 = arith.constant 0 : i32
    return %arg0, %c0_i32 : i32, i32
  }
  func.func @transform_1(%arg0: i32) -> (i32, i32) {
    %c0_i32 = arith.constant 0 : i32
    %c0_i32_0 = arith.constant 0 : i32
    %c0_i32_1 = arith.constant 0 : i32
    return %c0_i32, %c0_i32_0 : i32, i32
  }
  func.func @transform_2(%arg0: i32) -> (i32, i32) {
    %c0_i32 = arith.constant 0 : i32
    %c0_i32_0 = arith.constant 0 : i32
    %c0_i32_1 = arith.constant 0 : i32
    return %c0_i32, %c0_i32_0 : i32, i32
  }
  func.func @transform_3(%arg0: i32) -> (i32, i32) {
    %c0_i32 = arith.constant 0 : i32
    %c0_i32_0 = arith.constant 0 : i32
    %c0_i32_1 = arith.constant 0 : i32
    return %c0_i32, %c0_i32_0 : i32, i32
  }
  func.func @transform_4(%arg0: i32) -> (i32, i32) {
    %c0_i32 = arith.constant 0 : i32
    %c0_i32_0 = arith.constant 0 : i32
    %c0_i32_1 = arith.constant 0 : i32
    return %c0_i32, %c0_i32_0 : i32, i32
  }
  func.func @transform_5(%arg0: i32) -> (i32, i32) {
    %c0_i32 = arith.constant 0 : i32
    %c0_i32_0 = arith.constant 0 : i32
    return %arg0, %c0_i32 : i32, i32
  }
}

module attributes {stable_mosaic.version = 11 : i64} {
  func.func @_fused_ln_linear_kernel(%arg0: i32, %arg1: memref<8x128xf32, #tpu.memory_space<vmem>>, %arg2: memref<1x128xf32, #tpu.memory_space<vmem>>, %arg3: memref<1x128xf32, #tpu.memory_space<vmem>>, %arg4: memref<128x128xf32, #tpu.memory_space<vmem>>, %arg5: memref<1x128xf32, #tpu.memory_space<vmem>>, %arg6: memref<8x128xf32, #tpu.memory_space<vmem>>) attributes {dimension_semantics = [#tpu.dimension_semantics<parallel>], iteration_bounds = array<i64: 2>, scalar_prefetch = 0 : i64, scratch_operands = 0 : i64, tpu.core_type = #tpu.core_type<tc>, window_params = [{transform_indices = @transform_0, window_bounds = array<i64: 8, 128>}, {pipeline_mode = #tpu.pipeline_mode<synchronous>, transform_indices = @transform_1, window_bounds = array<i64: 1, 128>}, {pipeline_mode = #tpu.pipeline_mode<synchronous>, transform_indices = @transform_2, window_bounds = array<i64: 1, 128>}, {pipeline_mode = #tpu.pipeline_mode<synchronous>, transform_indices = @transform_3, window_bounds = array<i64: 128, 128>}, {pipeline_mode = #tpu.pipeline_mode<synchronous>, transform_indices = @transform_4, window_bounds = array<i64: 1, 128>}, {transform_indices = @transform_5, window_bounds = array<i64: 8, 128>}]} {
    %c0 = arith.constant 0 : index
    %c0_0 = arith.constant 0 : index
    %0 = vector.load %arg1[%c0, %c0_0] : memref<8x128xf32, #tpu.memory_space<vmem>>, vector<8x128xf32>
    %cst = arith.constant dense<0.000000e+00> : vector<8xf32>
    %1 = vector.multi_reduction <add>, %0, %cst [1] : vector<8x128xf32> to vector<8xf32>
    %2 = vector.shape_cast %1 : vector<8xf32> to vector<8x1xf32>
    %cst_1 = arith.constant 1.280000e+02 : f32
    %3 = vector.broadcast %cst_1 : f32 to vector<8x1xf32>
    %4 = arith.divf %2, %3 : vector<8x1xf32>
    %5 = vector.broadcast %4 : vector<8x1xf32> to vector<8x128xf32>
    %6 = arith.subf %0, %5 : vector<8x128xf32>
    %7 = arith.mulf %6, %6 : vector<8x128xf32>
    %cst_2 = arith.constant dense<0.000000e+00> : vector<8xf32>
    %8 = vector.multi_reduction <add>, %7, %cst_2 [1] : vector<8x128xf32> to vector<8xf32>
    %9 = vector.shape_cast %8 : vector<8xf32> to vector<8x1xf32>
    %cst_3 = arith.constant 1.280000e+02 : f32
    %10 = vector.broadcast %cst_3 : f32 to vector<8x1xf32>
    %11 = arith.divf %9, %10 : vector<8x1xf32>
    %cst_4 = arith.constant 9.99999974E-6 : f32
    %12 = vector.broadcast %cst_4 : f32 to vector<8x1xf32>
    %13 = arith.addf %11, %12 : vector<8x1xf32>
    %14 = math.rsqrt %13 : vector<8x1xf32>
    %15 = vector.broadcast %14 : vector<8x1xf32> to vector<8x128xf32>
    %16 = arith.mulf %6, %15 : vector<8x128xf32>
    %c0_5 = arith.constant 0 : index
    %c0_6 = arith.constant 0 : index
    %17 = vector.load %arg2[%c0_5, %c0_6] : memref<1x128xf32, #tpu.memory_space<vmem>>, vector<1x128xf32>
    %18 = vector.broadcast %17 : vector<1x128xf32> to vector<8x128xf32>
    %19 = arith.mulf %16, %18 : vector<8x128xf32>
    %c0_7 = arith.constant 0 : index
    %c0_8 = arith.constant 0 : index
    %20 = vector.load %arg3[%c0_7, %c0_8] : memref<1x128xf32, #tpu.memory_space<vmem>>, vector<1x128xf32>
    %21 = vector.broadcast %20 : vector<1x128xf32> to vector<8x128xf32>
    %22 = arith.addf %19, %21 : vector<8x128xf32>
    %c0_9 = arith.constant 0 : index
    %c0_10 = arith.constant 0 : index
    %23 = vector.load %arg4[%c0_9, %c0_10] : memref<128x128xf32, #tpu.memory_space<vmem>>, vector<128x128xf32>
    %cst_11 = arith.constant dense<0.000000e+00> : vector<8x128xf32>
    %24 = tpu.matmul %22, %23, %cst_11 {dimension_numbers = #tpu.dot_dimension_numbers<[1], [0], [0], [1], [0, 0, 1, 1], [], []>} : vector<8x128xf32>, vector<128x128xf32>, vector<8x128xf32> -> vector<8x128xf32>
    %c0_12 = arith.constant 0 : index
    %c0_13 = arith.constant 0 : index
    %25 = vector.load %arg5[%c0_12, %c0_13] : memref<1x128xf32, #tpu.memory_space<vmem>>, vector<1x128xf32>
    %26 = vector.broadcast %25 : vector<1x128xf32> to vector<8x128xf32>
    %27 = arith.addf %24, %26 : vector<8x128xf32>
    %c0_14 = arith.constant 0 : index
    %c0_15 = arith.constant 0 : index
    %28 = vector.load %arg6[%c0_14, %c0_15] : memref<8x128xf32, #tpu.memory_space<vmem>>, vector<8x128xf32>
    tpu.vector_store %arg6[%c0_14, %c0_15], %27 {strides = array<i32>} : memref<8x128xf32, #tpu.memory_space<vmem>>, vector<8x128xf32>,
    return
  }
  func.func @transform_0(%arg0: i32) -> (i32, i32) {
    %c0_i32 = arith.constant 0 : i32
    %c0_i32_0 = arith.constant 0 : i32
    return %arg0, %c0_i32 : i32, i32
  }
  func.func @transform_1(%arg0: i32) -> (i32, i32) {
    %c0_i32 = arith.constant 0 : i32
    %c0_i32_0 = arith.constant 0 : i32
    %c0_i32_1 = arith.constant 0 : i32
    return %c0_i32, %c0_i32_0 : i32, i32
  }
  func.func @transform_2(%arg0: i32) -> (i32, i32) {
    %c0_i32 = arith.constant 0 : i32
    %c0_i32_0 = arith.constant 0 : i32
    %c0_i32_1 = arith.constant 0 : i32
    return %c0_i32, %c0_i32_0 : i32, i32
  }
  func.func @transform_3(%arg0: i32) -> (i32, i32) {
    %c0_i32 = arith.constant 0 : i32
    %c0_i32_0 = arith.constant 0 : i32
    %c0_i32_1 = arith.constant 0 : i32
    return %c0_i32, %c0_i32_0 : i32, i32
  }
  func.func @transform_4(%arg0: i32) -> (i32, i32) {
    %c0_i32 = arith.constant 0 : i32
    %c0_i32_0 = arith.constant 0 : i32
    %c0_i32_1 = arith.constant 0 : i32
    return %c0_i32, %c0_i32_0 : i32, i32
  }
  func.func @transform_5(%arg0: i32) -> (i32, i32) {
    %c0_i32 = arith.constant 0 : i32
    %c0_i32_0 = arith.constant 0 : i32
    return %arg0, %c0_i32 : i32, i32
  }
}

</mosaic_0001>

<bundles_post_ra>
// kernel: tpu_custom_call.1
= control target key start
LH: loop header
LB: loop body
LE: loop exit
PB: predicated region body
PF: predicated region fallthrough
CT: control target
= control target key end

     0   :  { %10 = vsyncpa [#allocation3], 0  ;;  %s1006_s0 = inlined_call_operand.hbm [shape: f32[16,128], index: 0, kind: input, shape index: {}]   ;;  %s1007_s1 = inlined_call_operand.vmem [shape: f32[1,128], index: 1, kind: input, shape index: {}]   ;;  %s1008_s2 = inlined_call_operand.vmem [shape: f32[1,128], index: 2, kind: input, shape index: {}]   ;;  %s1009_s3 = inlined_call_operand.hbm [shape: f32[128,128], index: 3, kind: input, shape index: {}]   ;;  %s1010_s4 = inlined_call_operand.vmem [shape: f32[1,128], index: 4, kind: input, shape index: {}]   ;;  %s1011_s5 = inlined_call_operand.hbm [shape: f32[16,128], index: 5, kind: output, shape index: {}]  }
   0x1   :  { %12 = vsyncpa [#allocation3 + $0x1], 0 }
   0x2   :  { %13 = vsyncpa [#allocation6], 0 }
   0x3   :  { %14 = vsyncpa [#allocation4], 0 }
   0x4   :  { %16 = vsyncpa [#allocation4 + $0x1], 0  ;;  %s797_s18 = smov 0   ;;  %s799_s19 = smov 0  }
   0x5   :  { %s801_s20 = smov 0   ;;  %s803_s21 = smov 0  }
   0x6 LB: > { %s818_s22 = sadd.s32 4294967295, %s757_s21   ;;  %s472_s23 = sadd.s32 4294967294, %s757_s21   ;;  %s757_s21 = sphi %s803_s21, %s1031_s21   ;;  %s753_s20 = sphi %s801_s20, %s1030_s20   ;;  %s749_s19 = sphi %s799_s19, %s1029_s19   ;;  %s745_s18 = sphi %s797_s18, %s1028_s18  }
   0x7   : > { %p42_p0 = scmp.ne.s32.totalorder %s749_s19, %s745_s18  ;;  %p1012_p1 = scmp.eq.s32.totalorder %s818_s22, 0 }
   0x8   : > { %p156_p3 = scmp.eq.s32.totalorder %s472_s23, 1  ;;  %p473_p5 = scmp.ge.s32.totalorder %s757_s21, 1 }
   0x9   : > { %p827_p4 = por %p1012_p1, %p42_p0  ;;  %p163_p7 = scmp.lt.s32.totalorder %s757_s21, 3 }
   0xa   : > { %p832_p6 = por %p156_p3, %p42_p0  ;;  %s759_s27 = smov [#allocation5]  }
   0xb   : > { %s1015_s24 = scalar_select %p827_p4, 1, 0 }
   0xc   : > { %s1016_s25 = scalar_select %p832_p6, 1, 0 }
   0xd   : > { %p837_p8 = pnand %p473_p5, %p163_p7  ;;  %s181_s28 = sshll.u32 %s759_s27, 4  ;;  %s841_s28 = int_to_ptr.vmem [resolvable:$true] %s181_s28 }
   0xe   : > { %s853_s30 = sadd.s32 1, %s757_s21   ;;  %s29_s6 = sadd.s32 1, %s753_s20 }
   0xf   : > { %s1017_s26 = scalar_select %p837_p8, 1, 0 }
  0x10   : > { %p573_p9 = pneg %p837_p8  ;;  %s26_s7 = ssub.s32 %s757_s21, %s853_s30 }
  0x11   : > { %s629_s10 = scalar_lea.hbm %s1009_s3, 2048 }
  0x12   : > { %p848_p11 = pnand %p573_p9, %p1012_p1  ;;  %p630_p12 = scmp.ne.s32.totalorder %s1009_s3, %s629_s10 }
  0x13   : > { %p636_p5 = scmp.lt.u32.totalorder %s629_s10, %s1009_s3 }
  0x14   : > { %p631_p13 = pneg %p848_p11 }
  0x16   : > { %p632_p0 = pnand %p631_p13, %p630_p12 }
  0x18   : > { %p633_p3 = pneg %p632_p0 }
  0x1a   : > { %p638_p7 = pnand %p636_p5, %p633_p3 }
  0x1c   : > { %641 = shalt.err (!%p638_p7)
}
  0x1d   : > { %s642_s15 = scalar_lea.vmem %s841_s28, 2048  ;;  %p650_p2 = scmp.lt.s32.totalorder %s841_s28, %s841_s28 }
  0x1e   : > { %p643_p9 = scmp.ne.s32.totalorder %s841_s28, %s642_s15  ;;  %p651_p6 = scmp.lt.s32.totalorder %s642_s15, %s642_s15 }
  0x20   : > { %p645_p10 = pnand %p643_p9, %p631_p13  ;;  %p652_p4 = por %p651_p6, %p650_p2 }
  0x22   : > { %p646_p1 = pneg %p645_p10 }
  0x24   : > { %p653_p8 = pnand %p652_p4, %p646_p1 }
  0x26   : > { %656 = shalt.err (!%p653_p8)
}
  0x27   : > { %s760_s16 = smov 128   ;;  %s761_s17 = smov 8  }
  0x28   : > { %576 = dma.hbm_to_vmem [thread:$0]  (!%p848_p11), %s1009_s3, 2048, %s841_s28, [#allocation6], %s760_s16, %s760_s16, %s761_s17  }
  0x29   : > { %p27_p2 = scmp.eq.s32.totalorder %s26_s7, 0  ;;  %p36_p1 = scmp.ne.s32.totalorder %s753_s20, %s749_s19 }
  0x2a   : > { %p37_p4 = scmp.eq.s32.totalorder %s757_s21, 0  ;;  %p586_p6 = scmp.lt.s32.totalorder %s757_s21, 2 }
  0x2b   : > { %s884_s8 = scalar_select %p27_p2, %s753_s20, %s29_s6  }
  0x2c   : > { %p38_p8 = por %p37_p4, %p36_p1  ;;  %p1019_p10 = scmp.eq.s32.totalorder %s818_s22, 1 }
  0x2d   : > { %s198_s10 = sand.u32 1, %s753_s20   ;;  %s477_s11 = sshll.u32 %s757_s21, 7 }
  0x2e   : > { %p888_p12 = por %p1019_p10, %p36_p1  ;;  %s476_s12 = sshll.u32 %s198_s10, 3 }
  0x2f   : > { %s897_s14 = scalar_lea.hbm %s1006_s0, %s477_s11  ;;  %s202_s28 = scalar_lea.vmem [#allocation2], %s476_s12 }
  0x30   : > { %s209_s6 = sshll.u32 %s202_s28, 4  ;;  %p899_p11 = pnand %p586_p6, %p38_p8  ;;  %s903_s6 = int_to_ptr.vmem [resolvable:$true] %s209_s6 }
  0x31   : > { %s199_s15 = scalar_lea.sflag [#allocation3], %s198_s10  ;;  %s657_s16 = scalar_lea.hbm %s897_s14, 128 }
  0x32   : > { %p658_p13 = scmp.ne.s32.totalorder %s897_s14, %s657_s16  ;;  %p659_p0 = pneg %p899_p11 }
  0x33   : > { %s662_s27 = scalar_lea.hbm %s1006_s0, 256  ;;  %p663_p7 = scmp.lt.u32.totalorder %s897_s14, %s1006_s0 }
  0x34   : > { %p660_p3 = pnand %p659_p0, %p658_p13  ;;  %p664_p9 = scmp.lt.u32.totalorder %s662_s27, %s657_s16 }
  0x35   : > { %p666_p1 = scmp.lt.u32.totalorder %s657_s16, %s897_s14 }
  0x36   : > { %p661_p5 = pneg %p660_p3  ;;  %p665_p2 = por %p664_p9, %p663_p7 }
  0x38   : > { %p667_p4 = por %p666_p1, %p665_p2 }
  0x3a   : > { %p668_p6 = pnand %p667_p4, %p661_p5 }
  0x3c   : > { %671 = shalt.err (!%p668_p6)
}
  0x3d   : > { %s672_s10 = scalar_lea.vmem %s903_s6, 128  ;;  %s762_s29 = smov [#allocation2]  }
  0x3e   : > { %p673_p8 = scmp.ne.s32.totalorder %s903_s6, %s672_s10  ;;  %s677_s13 = sshll.u32 %s762_s29, 4  ;;  %s678_s13 = int_to_ptr.vmem [resolvable:$false] %s677_s13 }
  0x3f   : > { %s679_s28 = scalar_lea.vmem %s678_s13, 256  ;;  %p680_p3 = scmp.lt.s32.totalorder %s903_s6, %s678_s13 }
  0x40   : > { %p675_p10 = pnand %p673_p8, %p659_p0  ;;  %p681_p7 = scmp.lt.s32.totalorder %s679_s28, %s672_s10 }
  0x42   : > { %p676_p13 = pneg %p675_p10  ;;  %p682_p9 = por %p681_p7, %p680_p3 }
  0x44   : > { %p683_p2 = pnand %p682_p9, %p676_p13 }
  0x46   : > { %686 = shalt.err (!%p683_p2)
}
  0x47   : > { %580 = dma.hbm_to_vmem [thread:$0]  (!%p899_p11), %s897_s14, 128, %s903_s6, %s199_s15  }
  0x48   : > { %p1022_p5 = scmp.ne.s32.totalorder %s1017_s26, 0 }
  0x49   : > { %s933_s16 = sand.u32 (!%p1022_p5), 1, %s749_s19   ;;  %p1023_p0 = scmp.ne.s32.totalorder (!%p1022_p5), %s1015_s24, 0 }
  0x4a   : > { %218 = sbr.rel (%p1022_p5) target bundleno = 625 (0x271), region = 40  ;;  %s479_s17 = sshll.u32 (!%p1022_p5), %s933_s16, 3 }
  0x4b   : > { %s221_s23 = scalar_lea.sflag (!%p1022_p5), [#allocation3], %s933_s16  ;;  %s224_s27 = scalar_lea.vmem (!%p1022_p5), [#allocation2], %s479_s17 }
  0x51   : > { %732 = dma.done.wait (%p1023_p0), %s221_s23, 128  }
  0x52   : > { %734 = vsyncadd (%p1023_p0), %s221_s23, 4294967168  ;;  %p1024_p11 = scmp.eq.s32.totalorder %s818_s22, 0 }
  0x54   : > { %736 = dma.done.wait (%p1024_p11), [#allocation6], 2048   ;;  %p1025_p1 = pmov %p1024_p11 }
  0x55   : > { %v255_v0 = vld [vmem:[%s224_s27] sm:$0xff]  ;;  %v284_v1 = vld [vmem:[#allocation5] sm:$0xff]  ;;  %v285_v2 = vld [vmem:[#allocation5 + $0x8] sm:$0xff]  ;;  %v763_v4 = vmov 0.0|0.0   ;;  %vm764_vm0 = vmmov 0   ;;  %v765_v23 = vmov 0.0  }
  0x56   : > { %738 = vsyncadd (%p1025_p1), [#allocation6], 4294965248  ;;  %256 = vadd.xlane.f32.xlu0 %v255_v0  ;;  %v286_v3 = vld [vmem:[#allocation5 + $0x10] sm:$0xff]  ;;  %541 = vmatprep.subr.bf16.mxu0 %v763_v4  ;;  %v542_v5 = vpack.c.bf16 %v285_v2, %v284_v1  ;;  %v287_v6 = vld [vmem:[#allocation5 + $0x18] sm:$0xff]  ;;  %s486_s11 = sshll.u32 %s818_s22, 7  ;;  %s254_s12 = scalar_lea.vmem [#allocation7], %s479_s17 }
  0x57   : > { %v545_v7 = vpack.c.bf16 %v287_v6, %v286_v3  ;;  %v288_v8 = vld [vmem:[#allocation5 + $0x20] sm:$0xff]  ;;  %v289_v9 = vld [vmem:[#allocation5 + $0x28] sm:$0xff]  ;;  %v290_v15 = vld [vmem:[#allocation5 + $0x30] sm:$0xff]  ;;  %538 = vmatprep.mubr.msk.f32.mxu0 %vm764_vm0, %v765_v23  ;;  %s392_s10 = sshll.u32 %s254_s12, 4  ;;  %s962_s28 = scalar_lea.hbm %s1011_s5, %s486_s11  ;;  %s964_s10 = int_to_ptr.vmem [resolvable:$true] %s392_s10 }
  0x58   : > { %543 = vmatpush3.bf16.msra.mxu0 %v542_v5  ;;  %v548_v10 = vpack.c.bf16 %v289_v9, %v288_v8  ;;  %v291_v16 = vld [vmem:[#allocation5 + $0x38] sm:$0xff]  ;;  %v292_v18 = vld [vmem:[#allocation5 + $0x40] sm:$0xff]  ;;  %v293_v19 = vld [vmem:[#allocation5 + $0x48] sm:$0xff]  ;;  %s379_s23 = scalar_lea.sflag [#allocation4], %s933_s16  ;;  %s687_s27 = scalar_lea.vmem %s964_s10, 128 }
  0x59   : > { %544 = vmatprep.subr.bf16.mxu0 %v763_v4  ;;  %v551_v17 = vpack.c.bf16 %v291_v16, %v290_v15  ;;  %v554_v20 = vpack.c.bf16 %v293_v19, %v292_v18  ;;  %v294_v21 = vld [vmem:[#allocation5 + $0x50] sm:$0xff]  ;;  %v295_v22 = vld [vmem:[#allocation5 + $0x58] sm:$0xff]  ;;  %v296_v25 = vld [vmem:[#allocation5 + $0x60] sm:$0xff]  ;;  %p688_p4 = scmp.ne.s32.totalorder %s964_s10, %s687_s27  ;;  %s766_s22 = smov [#allocation7]  }
  0x5a   : > { %v557_v24 = vpack.c.bf16 %v295_v22, %v294_v21  ;;  %v297_v26 = vld [vmem:[#allocation5 + $0x68] sm:$0xff]  ;;  %v298_v28 = vld [vmem:[#allocation5 + $0x70] sm:$0xff]  ;;  %v299_v29 = vld [vmem:[#allocation5 + $0x78] sm:$0xff]  ;;  %s691_s17 = sshll.u32 %s766_s22, 4  ;;  %s692_s17 = int_to_ptr.vmem [resolvable:$false] %s691_s17 }
  0x5b   : > { %v560_v27 = vpack.c.bf16 %v297_v26, %v296_v25  ;;  %v563_v30 = vpack.c.bf16 %v299_v29, %v298_v28  ;;  %v482_v35 = vld [vmem:[%s1007_s1] ss:$0 sm:$0xff]  ;;  %p689_p6 = pnand %p688_p4, %p888_p12  ;;  %s693_s24 = scalar_lea.vmem %s692_s17, 256 }
  0x5c   : > { %546 = vmatpush3.bf16.msra.mxu0 %v545_v7  ;;  %v483_v37 = vld [vmem:[%s1008_s2] ss:$0 sm:$0xff]  ;;  %p694_p10 = scmp.lt.s32.totalorder %s964_s10, %s692_s17  ;;  %p695_p13 = scmp.lt.s32.totalorder %s693_s24, %s687_s27 }
  0x5d   : > { %547 = vmatprep.subr.bf16.mxu0 %v763_v4  ;;  %v484_v40 = vld [vmem:[%s1010_s4] ss:$0 sm:$0xff]  ;;  %p690_p8 = pneg %p689_p6 }
  0x5e   : > { %p696_p3 = por %p695_p13, %p694_p10 }
  0x60   : > { %549 = vmatpush3.bf16.msra.mxu0 %v548_v10  ;;  %p697_p7 = pnand %p696_p3, %p690_p8 }
  0x61   : > { %550 = vmatprep.subr.bf16.mxu0 %v763_v4 }
  0x64   : > { %552 = vmatpush3.bf16.msra.mxu0 %v551_v17 }
  0x65   : > { %553 = vmatprep.subr.bf16.mxu0 %v763_v4 }
  0x68   : > { %555 = vmatpush3.bf16.msra.mxu0 %v554_v20 }
  0x69   : > { %556 = vmatprep.subr.bf16.mxu0 %v763_v4 }
  0x6c   : > { %558 = vmatpush3.bf16.msra.mxu0 %v557_v24 }
  0x6d   : > { %559 = vmatprep.subr.bf16.mxu0 %v763_v4 }
  0x70   : > { %561 = vmatpush3.bf16.msra.mxu0 %v560_v27 }
  0x71   : > { %562 = vmatprep.subr.bf16.mxu0 %v763_v4 }
  0x74   : > { %564 = vmatpush3.bf16.msra.mxu0 %v563_v30 }
  0xe3   : > { %v257_v11 = vpop.xlane.xlu0 %256 }
  0xe4   : > { %v259_v12 = vmul.f32 0.0078125, %v257_v11 }
  0xe6   : > { %v260_v13 = vsub.f32 %v255_v0, %v259_v12 }
  0xe8   : > { %v261_v14 = vmul.f32 %v260_v13, %v260_v13 }
  0xea   : > { %262 = vadd.xlane.f32.xlu0 %v261_v14 }
 0x177   : > { %v263_v31 = vpop.xlane.xlu0 %262 }
 0x178   : > { %v264_v32 = vmul.f32 0.0078125, %v263_v31 }
 0x17a   : > { %v265_v33 = vadd.f32 1e-05, %v264_v32 }
 0x17c   : > { %627 = vrsqrt.f32 %v265_v33 }
 0x186   : > { %v628_v34 = vpop.eup %627 }
 0x187   : > { %v267_v36 = vmul.f32 %v628_v34, %v260_v13 }
 0x189   : > { %v275_v38 = vmul.f32 %v482_v35, %v267_v36 }
 0x18b   : > { %v283_v39 = vadd.f32 %v483_v37, %v275_v38 }
 0x18d   : > { %539 = vmatmul.mubr.f32.vlgmr.msra.gmra.mrb[0].mxu0 %v283_v39 }
 0x260   : > { %v373_v41 = vpop.f32.mrb[0].mxu0 }
 0x261   : > { %v374_v42 = vadd.f32 %v484_v40, %v373_v41  ;;  %v540_v43 = vpop.f32.mrb[1].mxu0 }
 0x263   : > { %377 = vst [vmem:[%s254_s12] sm:$0xff] %v374_v42 }
 0x264   : > { %700 = shalt.err (!%p697_p7)
}
 0x265   : > { %s701_s16 = scalar_lea.hbm %s962_s28, 128  ;;  %s705_s6 = scalar_lea.hbm %s1011_s5, 256 }
 0x266   : > { %p702_p9 = scmp.ne.s32.totalorder %s962_s28, %s701_s16  ;;  %p706_p0 = scmp.lt.u32.totalorder %s962_s28, %s1011_s5 }
 0x267   : > { %p707_p11 = scmp.lt.u32.totalorder %s705_s6, %s701_s16  ;;  %p709_p4 = scmp.lt.u32.totalorder %s701_s16, %s962_s28 }
 0x268   : > { %p703_p2 = pnand %p702_p9, %p888_p12 }
 0x269   : > { %p708_p1 = por %p707_p11, %p706_p0 }
 0x26a   : > { %p704_p5 = pneg %p703_p2 }
 0x26b   : > { %p710_p6 = por %p709_p4, %p708_p1 }
 0x26d   : > { %p711_p8 = pnand %p710_p6, %p704_p5 }
 0x26f   : > { %714 = shalt.err (!%p711_p8)
}
 0x270   : > { %571 = dma.vmem_to_hbm [thread:$0]  (%p888_p12), %s964_s10, 128, %s962_s28, %s379_s23  }
 0x271 PF: > { %s404_s11 = sand.u32 1, %s745_s18   ;;  %p1026_p10 = scmp.ne.s32.totalorder %s1016_s25, 0 }
 0x272   : > { %p1027_p13 = scmp.ge.s32.totalorder %s757_s21, 2  ;;  %s405_s12 = scalar_lea.sflag [#allocation4], %s404_s11 }
 0x274   : > { %p582_p3 = pnand %p1027_p13, %p1026_p10 }
 0x276   : > { %740 = dma.done.wait (!%p582_p3), %s405_s12, 128  }
 0x277   : > { %742 = vsyncadd (!%p582_p3), %s405_s12, 4294967168  ;;  %p19_p7 = scmp.ge.s32.totalorder %s853_s30, 4   ;;  %s1028_s18 = smov %s749_s19 }
 0x278   : > { %s1029_s19 = smov %s753_s20  ;;  %s1030_s20 = smov %s884_s8 }
 0x279   : > { %s1031_s21 = smov %s853_s30  ;;  %21 = sbr.rel (!%p19_p7) target bundleno = 6 (0x6), region = 89 }
 0x280   :  { %410 = vsyncpa [#allocation3], 1 }
 0x281   :  { %412 = vsyncpa [#allocation3 + $0x1], 1 }
 0x282   :  { %413 = vsyncpa [#allocation6], 1 }
 0x283   :  { %414 = vsyncpa [#allocation4], 1 }
 0x284   :  { %416 = vsyncpa [#allocation4 + $0x1], 1 }

// kernel: tpu_custom_call.1
= control target key start
LH: loop header
LB: loop body
LE: loop exit
PB: predicated region body
PF: predicated region fallthrough
CT: control target
= control target key end

     0   :  { %10 = vsyncpa [#allocation3], 0  ;;  %s1006_s0 = inlined_call_operand.hbm [shape: f32[16,128], index: 0, kind: input, shape index: {}]   ;;  %s1007_s1 = inlined_call_operand.vmem [shape: f32[1,128], index: 1, kind: input, shape index: {}]   ;;  %s1008_s2 = inlined_call_operand.vmem [shape: f32[1,128], index: 2, kind: input, shape index: {}]   ;;  %s1009_s3 = inlined_call_operand.hbm [shape: f32[128,128], index: 3, kind: input, shape index: {}]   ;;  %s1010_s4 = inlined_call_operand.vmem [shape: f32[1,128], index: 4, kind: input, shape index: {}]   ;;  %s1011_s5 = inlined_call_operand.hbm [shape: f32[16,128], index: 5, kind: output, shape index: {}]  }
   0x1   :  { %12 = vsyncpa [#allocation3 + $0x1], 0 }
   0x2   :  { %13 = vsyncpa [#allocation6], 0 }
   0x3   :  { %14 = vsyncpa [#allocation4], 0 }
   0x4   :  { %16 = vsyncpa [#allocation4 + $0x1], 0  ;;  %s797_s18 = smov 0   ;;  %s799_s19 = smov 0  }
   0x5   :  { %s801_s20 = smov 0   ;;  %s803_s21 = smov 0  }
   0x6 LB: > { %s818_s22 = sadd.s32 4294967295, %s757_s21   ;;  %s472_s23 = sadd.s32 4294967294, %s757_s21   ;;  %s757_s21 = sphi %s803_s21, %s1031_s21   ;;  %s753_s20 = sphi %s801_s20, %s1030_s20   ;;  %s749_s19 = sphi %s799_s19, %s1029_s19   ;;  %s745_s18 = sphi %s797_s18, %s1028_s18  }
   0x7   : > { %p42_p0 = scmp.ne.s32.totalorder %s749_s19, %s745_s18  ;;  %p1012_p1 = scmp.eq.s32.totalorder %s818_s22, 0 }
   0x8   : > { %p156_p3 = scmp.eq.s32.totalorder %s472_s23, 1  ;;  %p473_p5 = scmp.ge.s32.totalorder %s757_s21, 1 }
   0x9   : > { %p827_p4 = por %p1012_p1, %p42_p0  ;;  %p163_p7 = scmp.lt.s32.totalorder %s757_s21, 3 }
   0xa   : > { %p832_p6 = por %p156_p3, %p42_p0  ;;  %s759_s27 = smov [#allocation5]  }
   0xb   : > { %s1015_s24 = scalar_select %p827_p4, 1, 0 }
   0xc   : > { %s1016_s25 = scalar_select %p832_p6, 1, 0 }
   0xd   : > { %p837_p8 = pnand %p473_p5, %p163_p7  ;;  %s181_s28 = sshll.u32 %s759_s27, 4  ;;  %s841_s28 = int_to_ptr.vmem [resolvable:$true] %s181_s28 }
   0xe   : > { %s853_s30 = sadd.s32 1, %s757_s21   ;;  %s29_s6 = sadd.s32 1, %s753_s20 }
   0xf   : > { %s1017_s26 = scalar_select %p837_p8, 1, 0 }
  0x10   : > { %p573_p9 = pneg %p837_p8  ;;  %s26_s7 = ssub.s32 %s757_s21, %s853_s30 }
  0x11   : > { %s629_s10 = scalar_lea.hbm %s1009_s3, 2048 }
  0x12   : > { %p848_p11 = pnand %p573_p9, %p1012_p1  ;;  %p630_p12 = scmp.ne.s32.totalorder %s1009_s3, %s629_s10 }
  0x13   : > { %p636_p5 = scmp.lt.u32.totalorder %s629_s10, %s1009_s3 }
  0x14   : > { %p631_p13 = pneg %p848_p11 }
  0x16   : > { %p632_p0 = pnand %p631_p13, %p630_p12 }
  0x18   : > { %p633_p3 = pneg %p632_p0 }
  0x1a   : > { %p638_p7 = pnand %p636_p5, %p633_p3 }
  0x1c   : > { %641 = shalt.err (!%p638_p7)
}
  0x1d   : > { %s642_s15 = scalar_lea.vmem %s841_s28, 2048  ;;  %p650_p2 = scmp.lt.s32.totalorder %s841_s28, %s841_s28 }
  0x1e   : > { %p643_p9 = scmp.ne.s32.totalorder %s841_s28, %s642_s15  ;;  %p651_p6 = scmp.lt.s32.totalorder %s642_s15, %s642_s15 }
  0x20   : > { %p645_p10 = pnand %p643_p9, %p631_p13  ;;  %p652_p4 = por %p651_p6, %p650_p2 }
  0x22   : > { %p646_p1 = pneg %p645_p10 }
  0x24   : > { %p653_p8 = pnand %p652_p4, %p646_p1 }
  0x26   : > { %656 = shalt.err (!%p653_p8)
}
  0x27   : > { %s760_s16 = smov 128   ;;  %s761_s17 = smov 8  }
  0x28   : > { %576 = dma.hbm_to_vmem [thread:$0]  (!%p848_p11), %s1009_s3, 2048, %s841_s28, [#allocation6], %s760_s16, %s760_s16, %s761_s17  }
  0x29   : > { %p27_p2 = scmp.eq.s32.totalorder %s26_s7, 0  ;;  %p36_p1 = scmp.ne.s32.totalorder %s753_s20, %s749_s19 }
  0x2a   : > { %p37_p4 = scmp.eq.s32.totalorder %s757_s21, 0  ;;  %p586_p6 = scmp.lt.s32.totalorder %s757_s21, 2 }
  0x2b   : > { %s884_s8 = scalar_select %p27_p2, %s753_s20, %s29_s6  }
  0x2c   : > { %p38_p8 = por %p37_p4, %p36_p1  ;;  %p1019_p10 = scmp.eq.s32.totalorder %s818_s22, 1 }
  0x2d   : > { %s198_s10 = sand.u32 1, %s753_s20   ;;  %s477_s11 = sshll.u32 %s757_s21, 7 }
  0x2e   : > { %p888_p12 = por %p1019_p10, %p36_p1  ;;  %s476_s12 = sshll.u32 %s198_s10, 3 }
  0x2f   : > { %s897_s14 = scalar_lea.hbm %s1006_s0, %s477_s11  ;;  %s202_s28 = scalar_lea.vmem [#allocation2], %s476_s12 }
  0x30   : > { %s209_s6 = sshll.u32 %s202_s28, 4  ;;  %p899_p11 = pnand %p586_p6, %p38_p8  ;;  %s903_s6 = int_to_ptr.vmem [resolvable:$true] %s209_s6 }
  0x31   : > { %s199_s15 = scalar_lea.sflag [#allocation3], %s198_s10  ;;  %s657_s16 = scalar_lea.hbm %s897_s14, 128 }
  0x32   : > { %p658_p13 = scmp.ne.s32.totalorder %s897_s14, %s657_s16  ;;  %p659_p0 = pneg %p899_p11 }
  0x33   : > { %s662_s27 = scalar_lea.hbm %s1006_s0, 256  ;;  %p663_p7 = scmp.lt.u32.totalorder %s897_s14, %s1006_s0 }
  0x34   : > { %p660_p3 = pnand %p659_p0, %p658_p13  ;;  %p664_p9 = scmp.lt.u32.totalorder %s662_s27, %s657_s16 }
  0x35   : > { %p666_p1 = scmp.lt.u32.totalorder %s657_s16, %s897_s14 }
  0x36   : > { %p661_p5 = pneg %p660_p3  ;;  %p665_p2 = por %p664_p9, %p663_p7 }
  0x38   : > { %p667_p4 = por %p666_p1, %p665_p2 }
  0x3a   : > { %p668_p6 = pnand %p667_p4, %p661_p5 }
  0x3c   : > { %671 = shalt.err (!%p668_p6)
}
  0x3d   : > { %s672_s10 = scalar_lea.vmem %s903_s6, 128  ;;  %s762_s29 = smov [#allocation2]  }
  0x3e   : > { %p673_p8 = scmp.ne.s32.totalorder %s903_s6, %s672_s10  ;;  %s677_s13 = sshll.u32 %s762_s29, 4  ;;  %s678_s13 = int_to_ptr.vmem [resolvable:$false] %s677_s13 }
  0x3f   : > { %s679_s28 = scalar_lea.vmem %s678_s13, 256  ;;  %p680_p3 = scmp.lt.s32.totalorder %s903_s6, %s678_s13 }
  0x40   : > { %p675_p10 = pnand %p673_p8, %p659_p0  ;;  %p681_p7 = scmp.lt.s32.totalorder %s679_s28, %s672_s10 }
  0x42   : > { %p676_p13 = pneg %p675_p10  ;;  %p682_p9 = por %p681_p7, %p680_p3 }
  0x44   : > { %p683_p2 = pnand %p682_p9, %p676_p13 }
  0x46   : > { %686 = shalt.err (!%p683_p2)
}
  0x47   : > { %580 = dma.hbm_to_vmem [thread:$0]  (!%p899_p11), %s897_s14, 128, %s903_s6, %s199_s15  }
  0x48   : > { %p1022_p5 = scmp.ne.s32.totalorder %s1017_s26, 0 }
  0x49   : > { %s933_s16 = sand.u32 (!%p1022_p5), 1, %s749_s19   ;;  %p1023_p0 = scmp.ne.s32.totalorder (!%p1022_p5), %s1015_s24, 0 }
  0x4a   : > { %218 = sbr.rel (%p1022_p5) target bundleno = 625 (0x271), region = 40  ;;  %s479_s17 = sshll.u32 (!%p1022_p5), %s933_s16, 3 }
  0x4b   : > { %s221_s23 = scalar_lea.sflag (!%p1022_p5), [#allocation3], %s933_s16  ;;  %s224_s27 = scalar_lea.vmem (!%p1022_p5), [#allocation2], %s479_s17 }
  0x51   : > { %732 = dma.done.wait (%p1023_p0), %s221_s23, 128  }
  0x52   : > { %734 = vsyncadd (%p1023_p0), %s221_s23, 4294967168  ;;  %p1024_p11 = scmp.eq.s32.totalorder %s818_s22, 0 }
  0x54   : > { %736 = dma.done.wait (%p1024_p11), [#allocation6], 2048   ;;  %p1025_p1 = pmov %p1024_p11 }
  0x55   : > { %v255_v0 = vld [vmem:[%s224_s27] sm:$0xff]  ;;  %v284_v1 = vld [vmem:[#allocation5] sm:$0xff]  ;;  %v285_v2 = vld [vmem:[#allocation5 + $0x8] sm:$0xff]  ;;  %v763_v4 = vmov 0.0|0.0   ;;  %vm764_vm0 = vmmov 0   ;;  %v765_v23 = vmov 0.0  }
  0x56   : > { %738 = vsyncadd (%p1025_p1), [#allocation6], 4294965248  ;;  %256 = vadd.xlane.f32.xlu0 %v255_v0  ;;  %v286_v3 = vld [vmem:[#allocation5 + $0x10] sm:$0xff]  ;;  %541 = vmatprep.subr.bf16.mxu0 %v763_v4  ;;  %v542_v5 = vpack.c.bf16 %v285_v2, %v284_v1  ;;  %v287_v6 = vld [vmem:[#allocation5 + $0x18] sm:$0xff]  ;;  %s486_s11 = sshll.u32 %s818_s22, 7  ;;  %s254_s12 = scalar_lea.vmem [#allocation7], %s479_s17 }
  0x57   : > { %v545_v7 = vpack.c.bf16 %v287_v6, %v286_v3  ;;  %v288_v8 = vld [vmem:[#allocation5 + $0x20] sm:$0xff]  ;;  %v289_v9 = vld [vmem:[#allocation5 + $0x28] sm:$0xff]  ;;  %v290_v15 = vld [vmem:[#allocation5 + $0x30] sm:$0xff]  ;;  %538 = vmatprep.mubr.msk.f32.mxu0 %vm764_vm0, %v765_v23  ;;  %s392_s10 = sshll.u32 %s254_s12, 4  ;;  %s962_s28 = scalar_lea.hbm %s1011_s5, %s486_s11  ;;  %s964_s10 = int_to_ptr.vmem [resolvable:$true] %s392_s10 }
  0x58   : > { %543 = vmatpush3.bf16.msra.mxu0 %v542_v5  ;;  %v548_v10 = vpack.c.bf16 %v289_v9, %v288_v8  ;;  %v291_v16 = vld [vmem:[#allocation5 + $0x38] sm:$0xff]  ;;  %v292_v18 = vld [vmem:[#allocation5 + $0x40] sm:$0xff]  ;;  %v293_v19 = vld [vmem:[#allocation5 + $0x48] sm:$0xff]  ;;  %s379_s23 = scalar_lea.sflag [#allocation4], %s933_s16  ;;  %s687_s27 = scalar_lea.vmem %s964_s10, 128 }
  0x59   : > { %544 = vmatprep.subr.bf16.mxu0 %v763_v4  ;;  %v551_v17 = vpack.c.bf16 %v291_v16, %v290_v15  ;;  %v554_v20 = vpack.c.bf16 %v293_v19, %v292_v18  ;;  %v294_v21 = vld [vmem:[#allocation5 + $0x50] sm:$0xff]  ;;  %v295_v22 = vld [vmem:[#allocation5 + $0x58] sm:$0xff]  ;;  %v296_v25 = vld [vmem:[#allocation5 + $0x60] sm:$0xff]  ;;  %p688_p4 = scmp.ne.s32.totalorder %s964_s10, %s687_s27  ;;  %s766_s22 = smov [#allocation7]  }
  0x5a   : > { %v557_v24 = vpack.c.bf16 %v295_v22, %v294_v21  ;;  %v297_v26 = vld [vmem:[#allocation5 + $0x68] sm:$0xff]  ;;  %v298_v28 = vld [vmem:[#allocation5 + $0x70] sm:$0xff]  ;;  %v299_v29 = vld [vmem:[#allocation5 + $0x78] sm:$0xff]  ;;  %s691_s17 = sshll.u32 %s766_s22, 4  ;;  %s692_s17 = int_to_ptr.vmem [resolvable:$false] %s691_s17 }
  0x5b   : > { %v560_v27 = vpack.c.bf16 %v297_v26, %v296_v25  ;;  %v563_v30 = vpack.c.bf16 %v299_v29, %v298_v28  ;;  %v482_v35 = vld [vmem:[%s1007_s1] ss:$0 sm:$0xff]  ;;  %p689_p6 = pnand %p688_p4, %p888_p12  ;;  %s693_s24 = scalar_lea.vmem %s692_s17, 256 }
  0x5c   : > { %546 = vmatpush3.bf16.msra.mxu0 %v545_v7  ;;  %v483_v37 = vld [vmem:[%s1008_s2] ss:$0 sm:$0xff]  ;;  %p694_p10 = scmp.lt.s32.totalorder %s964_s10, %s692_s17  ;;  %p695_p13 = scmp.lt.s32.totalorder %s693_s24, %s687_s27 }
  0x5d   : > { %547 = vmatprep.subr.bf16.mxu0 %v763_v4  ;;  %v484_v40 = vld [vmem:[%s1010_s4] ss:$0 sm:$0xff]  ;;  %p690_p8 = pneg %p689_p6 }
  0x5e   : > { %p696_p3 = por %p695_p13, %p694_p10 }
  0x60   : > { %549 = vmatpush3.bf16.msra.mxu0 %v548_v10  ;;  %p697_p7 = pnand %p696_p3, %p690_p8 }
  0x61   : > { %550 = vmatprep.subr.bf16.mxu0 %v763_v4 }
  0x64   : > { %552 = vmatpush3.bf16.msra.mxu0 %v551_v17 }
  0x65   : > { %553 = vmatprep.subr.bf16.mxu0 %v763_v4 }
  0x68   : > { %555 = vmatpush3.bf16.msra.mxu0 %v554_v20 }
  0x69   : > { %556 = vmatprep.subr.bf16.mxu0 %v763_v4 }
  0x6c   : > { %558 = vmatpush3.bf16.msra.mxu0 %v557_v24 }
  0x6d   : > { %559 = vmatprep.subr.bf16.mxu0 %v763_v4 }
  0x70   : > { %561 = vmatpush3.bf16.msra.mxu0 %v560_v27 }
  0x71   : > { %562 = vmatprep.subr.bf16.mxu0 %v763_v4 }
  0x74   : > { %564 = vmatpush3.bf16.msra.mxu0 %v563_v30 }
  0xe3   : > { %v257_v11 = vpop.xlane.xlu0 %256 }
  0xe4   : > { %v259_v12 = vmul.f32 0.0078125, %v257_v11 }
  0xe6   : > { %v260_v13 = vsub.f32 %v255_v0, %v259_v12 }
  0xe8   : > { %v261_v14 = vmul.f32 %v260_v13, %v260_v13 }
  0xea   : > { %262 = vadd.xlane.f32.xlu0 %v261_v14 }
 0x177   : > { %v263_v31 = vpop.xlane.xlu0 %262 }
 0x178   : > { %v264_v32 = vmul.f32 0.0078125, %v263_v31 }
 0x17a   : > { %v265_v33 = vadd.f32 1e-05, %v264_v32 }
 0x17c   : > { %627 = vrsqrt.f32 %v265_v33 }
 0x186   : > { %v628_v34 = vpop.eup %627 }
 0x187   : > { %v267_v36 = vmul.f32 %v628_v34, %v260_v13 }
 0x189   : > { %v275_v38 = vmul.f32 %v482_v35, %v267_v36 }
 0x18b   : > { %v283_v39 = vadd.f32 %v483_v37, %v275_v38 }
 0x18d   : > { %539 = vmatmul.mubr.f32.vlgmr.msra.gmra.mrb[0].mxu0 %v283_v39 }
 0x260   : > { %v373_v41 = vpop.f32.mrb[0].mxu0 }
 0x261   : > { %v374_v42 = vadd.f32 %v484_v40, %v373_v41  ;;  %v540_v43 = vpop.f32.mrb[1].mxu0 }
 0x263   : > { %377 = vst [vmem:[%s254_s12] sm:$0xff] %v374_v42 }
 0x264   : > { %700 = shalt.err (!%p697_p7)
}
 0x265   : > { %s701_s16 = scalar_lea.hbm %s962_s28, 128  ;;  %s705_s6 = scalar_lea.hbm %s1011_s5, 256 }
 0x266   : > { %p702_p9 = scmp.ne.s32.totalorder %s962_s28, %s701_s16  ;;  %p706_p0 = scmp.lt.u32.totalorder %s962_s28, %s1011_s5 }
 0x267   : > { %p707_p11 = scmp.lt.u32.totalorder %s705_s6, %s701_s16  ;;  %p709_p4 = scmp.lt.u32.totalorder %s701_s16, %s962_s28 }
 0x268   : > { %p703_p2 = pnand %p702_p9, %p888_p12 }
 0x269   : > { %p708_p1 = por %p707_p11, %p706_p0 }
 0x26a   : > { %p704_p5 = pneg %p703_p2 }
 0x26b   : > { %p710_p6 = por %p709_p4, %p708_p1 }
 0x26d   : > { %p711_p8 = pnand %p710_p6, %p704_p5 }
 0x26f   : > { %714 = shalt.err (!%p711_p8)
}
 0x270   : > { %571 = dma.vmem_to_hbm [thread:$0]  (%p888_p12), %s964_s10, 128, %s962_s28, %s379_s23  }
 0x271 PF: > { %s404_s11 = sand.u32 1, %s745_s18   ;;  %p1026_p10 = scmp.ne.s32.totalorder %s1016_s25, 0 }
 0x272   : > { %p1027_p13 = scmp.ge.s32.totalorder %s757_s21, 2  ;;  %s405_s12 = scalar_lea.sflag [#allocation4], %s404_s11 }
 0x274   : > { %p582_p3 = pnand %p1027_p13, %p1026_p10 }
 0x276   : > { %740 = dma.done.wait (!%p582_p3), %s405_s12, 128  }
 0x277   : > { %742 = vsyncadd (!%p582_p3), %s405_s12, 4294967168  ;;  %p19_p7 = scmp.ge.s32.totalorder %s853_s30, 4   ;;  %s1028_s18 = smov %s749_s19 }
 0x278   : > { %s1029_s19 = smov %s753_s20  ;;  %s1030_s20 = smov %s884_s8 }
 0x279   : > { %s1031_s21 = smov %s853_s30  ;;  %21 = sbr.rel (!%p19_p7) target bundleno = 6 (0x6), region = 89 }
 0x280   :  { %410 = vsyncpa [#allocation3], 1 }
 0x281   :  { %412 = vsyncpa [#allocation3 + $0x1], 1 }
 0x282   :  { %413 = vsyncpa [#allocation6], 1 }
 0x283   :  { %414 = vsyncpa [#allocation4], 1 }
 0x284   :  { %416 = vsyncpa [#allocation4 + $0x1], 1 }

</bundles_post_ra>
